<compile_context>
chip_gen: v6e
topology: v6e:2x2x1
jax: 0.10.0
libtpu: 0.0.40
codegen_flags: <defaults>
</compile_context>

<pallas_src>
import functools
import math

import jax
import jax.numpy as jnp
from jax.experimental import pallas as pl
from jax.experimental.pallas import tpu as pltpu

BN_EPS = 1e-5


def _vmem_limit_bytes():
    """Generation-aware scoped-VMEM limit (leave headroom for Mosaic scratch)."""
    try:
        cap = int(pltpu.get_tpu_info().vmem_capacity_bytes)
    except Exception:  # older jax / non-TPU tracing: conservative fallback
        cap = 64 * 1024 * 1024
    return int(min(cap * 3 // 4, 100 * 1024 * 1024))


def _conv_stats_kernel(w_ref, x_ref, y_ref, sum_ref, ssq_ref, *,
                       tap_offsets, la, w_pad, ow_cols, stride):
    """Phase 1: fused conv (per-tap matmuls) + per-image BN partial stats.

    w_ref   : (T, C_out, C_in) f32   per-tap weight matrices, resident
    x_ref   : (1, C_in, FL)    bf16  flattened padded input image (+ tail)
    y_ref   : (1, C_out, LA)   bf16  raw conv result, flat (OH_rows, W_pad)
    sum_ref : (1, C_out, 1)    f32   per-image sum over valid positions
    ssq_ref : (1, C_out, 1)    f32   per-image sum of squares
    """
    c_out = y_ref.shape[1]
    # One aligned load of the whole slab; widen to f32 so the 9 unaligned lane
    # slices below stay on the well-trodden 32-bit path.
    x = x_ref[0].astype(jnp.float32)                     # (C_in, FL)

    acc = jnp.zeros((c_out, la), dtype=jnp.float32)
    for t, off in enumerate(tap_offsets):                # static unroll, T=KH*KW
        acc = acc + jnp.dot(w_ref[t], x[:, off:off + la],
                            preferred_element_type=jnp.float32)

    # Raw conv result goes back to HBM as bf16 (halves the round trip); the
    # statistics below are taken from the f32 accumulator.
    y_ref[0] = acc.astype(y_ref.dtype)

    # Mask out the "wrap" columns (and, for stride > 1, non-strided positions)
    # so the BN statistics see exactly the cropped PyTorch tensor.
    pos = jax.lax.broadcasted_iota(jnp.int32, (1, la), 1)
    col = pos % w_pad
    valid = col < ow_cols
    if stride > 1:
        valid = valid & ((col % stride) == 0) & (((pos // w_pad) % stride) == 0)
    yv = jnp.where(valid, acc, 0.0)
    sum_ref[0] = jnp.sum(yv, axis=1, keepdims=True)       # (C_out, 1), XLU
    ssq_ref[0] = jnp.sum(yv * yv, axis=1, keepdims=True)


def _bn_silu_kernel(scale_ref, shift_ref, y_ref, o_ref):
    """Phase 2: y*scale + shift, exact SiLU, compacting W_pad -> OW on store.

    scale_ref/shift_ref : (C_out, 1, 1) f32, resident
    y_ref               : (1, C_out, OH_rows, W_pad) bf16
    o_ref               : (1, C_out, OH_rows, OW_cols) f32
    """
    ow = o_ref.shape[3]
    z = (y_ref[0, :, :, :ow].astype(jnp.float32) * scale_ref[...]
         + shift_ref[...])
    # SiLU: z * sigmoid(z) == 0.5 * z * (1 + tanh(z / 2))  (single EUP op).
    o_ref[0] = 0.5 * z * (1.0 + jnp.tanh(0.5 * z))


@functools.partial(jax.jit, static_argnames=("kernel_size", "stride",
                                             "padding", "dilation"))
def conv_module_forward(x, conv_weight, bn_gamma, bn_beta, *,
                        kernel_size=3, stride=1, padding=0, dilation=1):
    """Forward of ConvModule. x: (N, C_in, H, W) NCHW f32 -> NCHW f32."""
    n, c_in, h, w = x.shape
    c_out = conv_weight.shape[0]
    ks, s, p, d = kernel_size, stride, padding, dilation

    # Conv output extent, then the module's crop to (H//s, W//s).
    conv_oh = (h + 2 * p - d * (ks - 1) - 1) // s + 1
    conv_ow = (w + 2 * p - d * (ks - 1) - 1) // s + 1
    oh = min(conv_oh, h // s)
    ow = min(conv_ow, w // s)

    h_pad, w_pad = h + 2 * p, w + 2 * p
    oh_rows = (oh - 1) * s + 1          # dense output rows the taps must cover
    ow_cols = (ow - 1) * s + 1          # dense output cols the taps must cover
    la = oh_rows * w_pad                # flat per-image accumulator length

    # Per-tap flat offsets into the (H_pad*W_pad)-flattened padded image, plus
    # a small zero tail so every tap's length-LA view stays in bounds.
    tap_offsets = tuple(kh * d * w_pad + kw * d
                        for kh in range(ks) for kw in range(ks))
    tail = max(0, max(tap_offsets) + la - h_pad * w_pad)
    fl = h_pad * w_pad + tail
    t = ks * ks

    # ---- glue: pad + flatten the input (NO im2col), per-tap weight matrices.
    xp = x
    if p > 0:
        xp = jnp.pad(xp, ((0, 0), (0, 0), (p, p), (p, p)))
    x2d = xp.reshape(n, c_in, h_pad * w_pad)
    if tail > 0:
        x2d = jnp.pad(x2d, ((0, 0), (0, 0), (0, tail)))
    x2d = x2d.astype(jnp.bfloat16)                        # halve x DMA traffic
    w_taps = (jnp.transpose(conv_weight, (2, 3, 0, 1))
              .reshape(t, c_out, c_in).astype(jnp.float32))

    vmem_limit = _vmem_limit_bytes()

    # ---- Phase 1: fused conv + per-image BN partial statistics.
    kern1 = functools.partial(_conv_stats_kernel, tap_offsets=tap_offsets,
                              la=la, w_pad=w_pad, ow_cols=ow_cols, stride=s)
    y_flat, psum, pssq = pl.pallas_call(
        kern1,
        out_shape=(jax.ShapeDtypeStruct((n, c_out, la), jnp.bfloat16),
                   jax.ShapeDtypeStruct((n, c_out, 1), jnp.float32),
                   jax.ShapeDtypeStruct((n, c_out, 1), jnp.float32)),
        grid=(n,),
        in_specs=[
            pl.BlockSpec((t, c_out, c_in), lambda i: (0, 0, 0)),   # weights
            pl.BlockSpec((1, c_in, fl), lambda i: (i, 0, 0)),      # image slab
        ],
        out_specs=(
            pl.BlockSpec((1, c_out, la), lambda i: (i, 0, 0)),     # raw conv
            pl.BlockSpec((1, c_out, 1), lambda i: (i, 0, 0)),      # partial sum
            pl.BlockSpec((1, c_out, 1), lambda i: (i, 0, 0)),      # partial ssq
        ),
        compiler_params=pltpu.CompilerParams(
            dimension_semantics=("parallel",),    # per-image partials -> both
            vmem_limit_bytes=vmem_limit),         # cores usable on v7x
        cost_estimate=pl.CostEstimate(
            flops=2 * n * t * c_out * c_in * la,
            transcendentals=0,
            bytes_accessed=(n * (c_in * fl * 2 + c_out * la * 2 + 2 * c_out * 4)
                            + t * c_out * c_in * 4)),
    )(w_taps, x2d)

    # ---- tiny glue: reduce partials, fold BN affine into scale/shift.
    count = float(n * oh * ow)
    ch_sum = jnp.sum(psum[:, :, 0], axis=0)               # (C_out,)
    ch_ssq = jnp.sum(pssq[:, :, 0], axis=0)
    mean = ch_sum / count
    # TODO(synk): biased E[y^2]-mean^2 can lose precision when |mean| >> std;
    # switch to a shifted / Welford combination if bit-parity with torch matters.
    var = jnp.maximum(ch_ssq / count - mean * mean, 0.0)
    scale = bn_gamma.astype(jnp.float32) * jax.lax.rsqrt(var + BN_EPS)
    shift = bn_beta.astype(jnp.float32) - mean * scale
    scale3 = scale.reshape(c_out, 1, 1)
    shift3 = shift.reshape(c_out, 1, 1)

    # ---- Phase 2: normalize + SiLU, writing the final NCHW layout directly.
    y4 = y_flat.reshape(n, c_out, oh_rows, w_pad)          # metadata-only
    out = pl.pallas_call(
        _bn_silu_kernel,
        out_shape=jax.ShapeDtypeStruct((n, c_out, oh_rows, ow_cols),
                                       jnp.float32),
        grid=(n,),
        in_specs=[
            pl.BlockSpec((c_out, 1, 1), lambda i: (0, 0, 0)),            # scale
            pl.BlockSpec((c_out, 1, 1), lambda i: (0, 0, 0)),            # shift
            pl.BlockSpec((1, c_out, oh_rows, w_pad), lambda i: (i, 0, 0, 0)),
        ],
        out_specs=pl.BlockSpec((1, c_out, oh_rows, ow_cols),
                               lambda i: (i, 0, 0, 0)),
        compiler_params=pltpu.CompilerParams(
            dimension_semantics=("parallel",),
            vmem_limit_bytes=vmem_limit),
        cost_estimate=pl.CostEstimate(
            flops=6 * n * c_out * oh_rows * ow_cols,
            transcendentals=n * c_out * oh_rows * ow_cols,
            bytes_accessed=n * c_out * (oh_rows * w_pad * 2
                                        + oh_rows * ow_cols * 4)
                           + 2 * c_out * 4),
    )(scale3, shift3, y4)

    if s > 1:
        # Non-default stride: the kernels computed the dense (stride-1) grid;
        # subsample in glue (zero overhead for the default stride == 1).
        out = out[:, :, ::s, ::s]
    return out


if __name__ == "__main__":
    # Small shapes consistent with the module: ConvModule(n_in=4, n_out=8,
    # kernel_size=3, stride=1, padding=0, bias=False, bn=True, act=SiLU).
    N, C_IN, H, W = 2, 4, 16, 16
    C_OUT, KS = 8, 3

    key = jax.random.PRNGKey(0)
    kx, kw = jax.random.split(key)

    x = jax.random.normal(kx, (N, C_IN, H, W), dtype=jnp.float32)

    # Deterministic parameter init (Conv2d kaiming-uniform-like bound; BN defaults).
    fan_in = C_IN * KS * KS
    bound = 1.0 / math.sqrt(fan_in)
    conv_weight = jax.random.uniform(kw, (C_OUT, C_IN, KS, KS),
                                     minval=-bound, maxval=bound,
                                     dtype=jnp.float32)
    bn_gamma = jnp.ones((C_OUT,), dtype=jnp.float32)
    bn_beta = jnp.zeros((C_OUT,), dtype=jnp.float32)

    out = conv_module_forward(x, conv_weight, bn_gamma, bn_beta,
                              kernel_size=KS, stride=1, padding=0, dilation=1)
    jax.block_until_ready(out)

    assert out.shape == (N, C_OUT, H - 2, W - 2), out.shape
    assert bool(jnp.all(jnp.isfinite(out))), "non-finite output"

    # Pure-JAX reference (f32 conv -> crop -> train-mode BN -> SiLU); the
    # kernel path uses a bf16 input/intermediate, so the tolerance is loose.
    ref = jax.lax.conv_general_dilated(
        x, conv_weight, window_strides=(1, 1), padding=((0, 0), (0, 0)),
        rhs_dilation=(1, 1), dimension_numbers=("NCHW", "OIHW", "NCHW"))
    ref = ref[:, :, :H, :W]
    mu = jnp.mean(ref, axis=(0, 2, 3), keepdims=True)
    va = jnp.mean((ref - mu) ** 2, axis=(0, 2, 3), keepdims=True)
    ref = (ref - mu) * jax.lax.rsqrt(va + BN_EPS)
    ref = ref * bn_gamma.reshape(1, -1, 1, 1) + bn_beta.reshape(1, -1, 1, 1)
    ref = ref * jax.nn.sigmoid(ref)
    err = float(jnp.max(jnp.abs(out - ref)))
    assert err < 1e-1, f"max abs error vs reference: {err}"

    print("KERNEL_OK")
</pallas_src>

<mosaic_0001>
module attributes {stable_mosaic.version = 11 : i64} {
  func.func @_bn_silu_kernel(%arg0: i32, %arg1: memref<8x1x1xf32, #tpu.memory_space<vmem>>, %arg2: memref<8x1x1xf32, #tpu.memory_space<vmem>>, %arg3: memref<1x8x14x16xbf16, #tpu.memory_space<vmem>>, %arg4: memref<1x8x14x14xf32, #tpu.memory_space<vmem>>) attributes {dimension_semantics = [#tpu.dimension_semantics<parallel>], iteration_bounds = array<i64: 2>, scalar_prefetch = 0 : i64, scratch_operands = 0 : i64, tpu.core_type = #tpu.core_type<tc>, window_params = [{pipeline_mode = #tpu.pipeline_mode<synchronous>, transform_indices = @transform_0, window_bounds = array<i64: 8, 1, 1>}, {pipeline_mode = #tpu.pipeline_mode<synchronous>, transform_indices = @transform_1, window_bounds = array<i64: 8, 1, 1>}, {transform_indices = @transform_2, window_bounds = array<i64: 1, 8, 14, 16>}, {transform_indices = @transform_3, window_bounds = array<i64: 1, 8, 14, 14>}]} {
    %c0 = arith.constant 0 : index
    %c0_0 = arith.constant 0 : index
    %c0_1 = arith.constant 0 : index
    %c0_2 = arith.constant 0 : index
    %0 = vector.load %arg3[%c0, %c0_0, %c0_1, %c0_2] : memref<1x8x14x16xbf16, #tpu.memory_space<vmem>>, vector<1x8x14x14xbf16>
    %1 = vector.shape_cast %0 : vector<1x8x14x14xbf16> to vector<8x14x14xbf16>
    %2 = arith.extf %1 : vector<8x14x14xbf16> to vector<8x14x14xf32>
    %c0_3 = arith.constant 0 : index
    %c0_4 = arith.constant 0 : index
    %c0_5 = arith.constant 0 : index
    %3 = vector.load %arg1[%c0_3, %c0_4, %c0_5] : memref<8x1x1xf32, #tpu.memory_space<vmem>>, vector<8x1x1xf32>
    %4 = vector.broadcast %3 : vector<8x1x1xf32> to vector<8x14x14xf32>
    %5 = arith.mulf %2, %4 : vector<8x14x14xf32>
    %c0_6 = arith.constant 0 : index
    %c0_7 = arith.constant 0 : index
    %c0_8 = arith.constant 0 : index
    %6 = vector.load %arg2[%c0_6, %c0_7, %c0_8] : memref<8x1x1xf32, #tpu.memory_space<vmem>>, vector<8x1x1xf32>
    %7 = vector.broadcast %6 : vector<8x1x1xf32> to vector<8x14x14xf32>
    %8 = arith.addf %5, %7 : vector<8x14x14xf32>
    %cst = arith.constant 5.000000e-01 : f32
    %9 = vector.broadcast %cst : f32 to vector<8x14x14xf32>
    %10 = arith.mulf %9, %8 : vector<8x14x14xf32>
    %cst_9 = arith.constant 5.000000e-01 : f32
    %11 = vector.broadcast %cst_9 : f32 to vector<8x14x14xf32>
    %12 = arith.mulf %11, %8 : vector<8x14x14xf32>
    %13 = math.tanh %12 : vector<8x14x14xf32>
    %cst_10 = arith.constant 1.000000e+00 : f32
    %14 = vector.broadcast %cst_10 : f32 to vector<8x14x14xf32>
    %15 = arith.addf %14, %13 : vector<8x14x14xf32>
    %16 = arith.mulf %10, %15 : vector<8x14x14xf32>
    %c0_11 = arith.constant 0 : index
    %c0_12 = arith.constant 0 : index
    %c0_13 = arith.constant 0 : index
    %c0_14 = arith.constant 0 : index
    %17 = vector.load %arg4[%c0_11, %c0_12, %c0_13, %c0_14] : memref<1x8x14x14xf32, #tpu.memory_space<vmem>>, vector<1x8x14x14xf32>
    %18 = vector.shape_cast %17 : vector<1x8x14x14xf32> to vector<8x14x14xf32>
    %19 = vector.shape_cast %16 : vector<8x14x14xf32> to vector<1x8x14x14xf32>
    tpu.vector_store %arg4[%c0_11, %c0_12, %c0_13, %c0_14], %19 {strides = array<i32>} : memref<1x8x14x14xf32, #tpu.memory_space<vmem>>, vector<1x8x14x14xf32>,
    return
  }
  func.func @transform_0(%arg0: i32) -> (i32, i32, i32) {
    %c0_i32 = arith.constant 0 : i32
    %c0_i32_0 = arith.constant 0 : i32
    %c0_i32_1 = arith.constant 0 : i32
    %c0_i32_2 = arith.constant 0 : i32
    return %c0_i32, %c0_i32_0, %c0_i32_1 : i32, i32, i32
  }
  func.func @transform_1(%arg0: i32) -> (i32, i32, i32) {
    %c0_i32 = arith.constant 0 : i32
    %c0_i32_0 = arith.constant 0 : i32
    %c0_i32_1 = arith.constant 0 : i32
    %c0_i32_2 = arith.constant 0 : i32
    return %c0_i32, %c0_i32_0, %c0_i32_1 : i32, i32, i32
  }
  func.func @transform_2(%arg0: i32) -> (i32, i32, i32, i32) {
    %c0_i32 = arith.constant 0 : i32
    %c0_i32_0 = arith.constant 0 : i32
    %c0_i32_1 = arith.constant 0 : i32
    %c0_i32_2 = arith.constant 0 : i32
    return %arg0, %c0_i32, %c0_i32_0, %c0_i32_1 : i32, i32, i32, i32
  }
  func.func @transform_3(%arg0: i32) -> (i32, i32, i32, i32) {
    %c0_i32 = arith.constant 0 : i32
    %c0_i32_0 = arith.constant 0 : i32
    %c0_i32_1 = arith.constant 0 : i32
    %c0_i32_2 = arith.constant 0 : i32
    return %arg0, %c0_i32, %c0_i32_0, %c0_i32_1 : i32, i32, i32, i32
  }
}

module attributes {stable_mosaic.version = 11 : i64} {
  func.func @_conv_stats_kernel(%arg0: i32, %arg1: memref<9x8x4xf32, #tpu.memory_space<vmem>>, %arg2: memref<1x4x258xbf16, #tpu.memory_space<vmem>>, %arg3: memref<1x8x224xbf16, #tpu.memory_space<vmem>>, %arg4: memref<1x8x1xf32, #tpu.memory_space<vmem>>, %arg5: memref<1x8x1xf32, #tpu.memory_space<vmem>>) attributes {dimension_semantics = [#tpu.dimension_semantics<parallel>], iteration_bounds = array<i64: 2>, scalar_prefetch = 0 : i64, scratch_operands = 0 : i64, tpu.core_type = #tpu.core_type<tc>, window_params = [{pipeline_mode = #tpu.pipeline_mode<synchronous>, transform_indices = @transform_0, window_bounds = array<i64: 9, 8, 4>}, {transform_indices = @transform_1, window_bounds = array<i64: 1, 4, 258>}, {transform_indices = @transform_2, window_bounds = array<i64: 1, 8, 224>}, {transform_indices = @transform_3, window_bounds = array<i64: 1, 8, 1>}, {transform_indices = @transform_4, window_bounds = array<i64: 1, 8, 1>}]} {
    %c0 = arith.constant 0 : index
    %c0_0 = arith.constant 0 : index
    %c0_1 = arith.constant 0 : index
    %0 = vector.load %arg2[%c0, %c0_0, %c0_1] : memref<1x4x258xbf16, #tpu.memory_space<vmem>>, vector<1x4x258xbf16>
    %1 = vector.shape_cast %0 : vector<1x4x258xbf16> to vector<4x258xbf16>
    %2 = arith.extf %1 : vector<4x258xbf16> to vector<4x258xf32>
    %cst = arith.constant 0.000000e+00 : f32
    %3 = vector.broadcast %cst : f32 to vector<8x224xf32>
    %c0_2 = arith.constant 0 : index
    %c0_3 = arith.constant 0 : index
    %c0_4 = arith.constant 0 : index
    %4 = vector.load %arg1[%c0_2, %c0_3, %c0_4] : memref<9x8x4xf32, #tpu.memory_space<vmem>>, vector<1x8x4xf32>
    %5 = vector.shape_cast %4 : vector<1x8x4xf32> to vector<8x4xf32>
    %6 = vector.extract_strided_slice %2 {offsets = [0, 0], sizes = [4, 224], strides = [1, 1]} : vector<4x258xf32> to vector<4x224xf32>
    %cst_5 = arith.constant dense<0.000000e+00> : vector<8x224xf32>
    %7 = tpu.matmul %5, %6, %cst_5 {dimension_numbers = #tpu.dot_dimension_numbers<[1], [0], [0], [1], [0, 0, 1, 1], [], []>} : vector<8x4xf32>, vector<4x224xf32>, vector<8x224xf32> -> vector<8x224xf32>
    %8 = arith.addf %3, %7 : vector<8x224xf32>
    %c1 = arith.constant 1 : index
    %c0_6 = arith.constant 0 : index
    %c0_7 = arith.constant 0 : index
    %9 = vector.load %arg1[%c1, %c0_6, %c0_7] : memref<9x8x4xf32, #tpu.memory_space<vmem>>, vector<1x8x4xf32>
    %10 = vector.shape_cast %9 : vector<1x8x4xf32> to vector<8x4xf32>
    %11 = vector.extract_strided_slice %2 {offsets = [0, 1], sizes = [4, 224], strides = [1, 1]} : vector<4x258xf32> to vector<4x224xf32>
    %cst_8 = arith.constant dense<0.000000e+00> : vector<8x224xf32>
    %12 = tpu.matmul %10, %11, %cst_8 {dimension_numbers = #tpu.dot_dimension_numbers<[1], [0], [0], [1], [0, 0, 1, 1], [], []>} : vector<8x4xf32>, vector<4x224xf32>, vector<8x224xf32> -> vector<8x224xf32>
    %13 = arith.addf %8, %12 : vector<8x224xf32>
    %c2 = arith.constant 2 : index
    %c0_9 = arith.constant 0 : index
    %c0_10 = arith.constant 0 : index
    %14 = vector.load %arg1[%c2, %c0_9, %c0_10] : memref<9x8x4xf32, #tpu.memory_space<vmem>>, vector<1x8x4xf32>
    %15 = vector.shape_cast %14 : vector<1x8x4xf32> to vector<8x4xf32>
    %16 = vector.extract_strided_slice %2 {offsets = [0, 2], sizes = [4, 224], strides = [1, 1]} : vector<4x258xf32> to vector<4x224xf32>
    %cst_11 = arith.constant dense<0.000000e+00> : vector<8x224xf32>
    %17 = tpu.matmul %15, %16, %cst_11 {dimension_numbers = #tpu.dot_dimension_numbers<[1], [0], [0], [1], [0, 0, 1, 1], [], []>} : vector<8x4xf32>, vector<4x224xf32>, vector<8x224xf32> -> vector<8x224xf32>
    %18 = arith.addf %13, %17 : vector<8x224xf32>
    %c3 = arith.constant 3 : index
    %c0_12 = arith.constant 0 : index
    %c0_13 = arith.constant 0 : index
    %19 = vector.load %arg1[%c3, %c0_12, %c0_13] : memref<9x8x4xf32, #tpu.memory_space<vmem>>, vector<1x8x4xf32>
    %20 = vector.shape_cast %19 : vector<1x8x4xf32> to vector<8x4xf32>
    %21 = vector.extract_strided_slice %2 {offsets = [0, 16], sizes = [4, 224], strides = [1, 1]} : vector<4x258xf32> to vector<4x224xf32>
    %cst_14 = arith.constant dense<0.000000e+00> : vector<8x224xf32>
    %22 = tpu.matmul %20, %21, %cst_14 {dimension_numbers = #tpu.dot_dimension_numbers<[1], [0], [0], [1], [0, 0, 1, 1], [], []>} : vector<8x4xf32>, vector<4x224xf32>, vector<8x224xf32> -> vector<8x224xf32>
    %23 = arith.addf %18, %22 : vector<8x224xf32>
    %c4 = arith.constant 4 : index
    %c0_15 = arith.constant 0 : index
    %c0_16 = arith.constant 0 : index
    %24 = vector.load %arg1[%c4, %c0_15, %c0_16] : memref<9x8x4xf32, #tpu.memory_space<vmem>>, vector<1x8x4xf32>
    %25 = vector.shape_cast %24 : vector<1x8x4xf32> to vector<8x4xf32>
    %26 = vector.extract_strided_slice %2 {offsets = [0, 17], sizes = [4, 224], strides = [1, 1]} : vector<4x258xf32> to vector<4x224xf32>
    %cst_17 = arith.constant dense<0.000000e+00> : vector<8x224xf32>
    %27 = tpu.matmul %25, %26, %cst_17 {dimension_numbers = #tpu.dot_dimension_numbers<[1], [0], [0], [1], [0, 0, 1, 1], [], []>} : vector<8x4xf32>, vector<4x224xf32>, vector<8x224xf32> -> vector<8x224xf32>
    %28 = arith.addf %23, %27 : vector<8x224xf32>
    %c5 = arith.constant 5 : index
    %c0_18 = arith.constant 0 : index
    %c0_19 = arith.constant 0 : index
    %29 = vector.load %arg1[%c5, %c0_18, %c0_19] : memref<9x8x4xf32, #tpu.memory_space<vmem>>, vector<1x8x4xf32>
    %30 = vector.shape_cast %29 : vector<1x8x4xf32> to vector<8x4xf32>
    %31 = vector.extract_strided_slice %2 {offsets = [0, 18], sizes = [4, 224], strides = [1, 1]} : vector<4x258xf32> to vector<4x224xf32>
    %cst_20 = arith.constant dense<0.000000e+00> : vector<8x224xf32>
    %32 = tpu.matmul %30, %31, %cst_20 {dimension_numbers = #tpu.dot_dimension_numbers<[1], [0], [0], [1], [0, 0, 1, 1], [], []>} : vector<8x4xf32>, vector<4x224xf32>, vector<8x224xf32> -> vector<8x224xf32>
    %33 = arith.addf %28, %32 : vector<8x224xf32>
    %c6 = arith.constant 6 : index
    %c0_21 = arith.constant 0 : index
    %c0_22 = arith.constant 0 : index
    %34 = vector.load %arg1[%c6, %c0_21, %c0_22] : memref<9x8x4xf32, #tpu.memory_space<vmem>>, vector<1x8x4xf32>
    %35 = vector.shape_cast %34 : vector<1x8x4xf32> to vector<8x4xf32>
    %36 = vector.extract_strided_slice %2 {offsets = [0, 32], sizes = [4, 224], strides = [1, 1]} : vector<4x258xf32> to vector<4x224xf32>
    %cst_23 = arith.constant dense<0.000000e+00> : vector<8x224xf32>
    %37 = tpu.matmul %35, %36, %cst_23 {dimension_numbers = #tpu.dot_dimension_numbers<[1], [0], [0], [1], [0, 0, 1, 1], [], []>} : vector<8x4xf32>, vector<4x224xf32>, vector<8x224xf32> -> vector<8x224xf32>
    %38 = arith.addf %33, %37 : vector<8x224xf32>
    %c7 = arith.constant 7 : index
    %c0_24 = arith.constant 0 : index
    %c0_25 = arith.constant 0 : index
    %39 = vector.load %arg1[%c7, %c0_24, %c0_25] : memref<9x8x4xf32, #tpu.memory_space<vmem>>, vector<1x8x4xf32>
    %40 = vector.shape_cast %39 : vector<1x8x4xf32> to vector<8x4xf32>
    %41 = vector.extract_strided_slice %2 {offsets = [0, 33], sizes = [4, 224], strides = [1, 1]} : vector<4x258xf32> to vector<4x224xf32>
    %cst_26 = arith.constant dense<0.000000e+00> : vector<8x224xf32>
    %42 = tpu.matmul %40, %41, %cst_26 {dimension_numbers = #tpu.dot_dimension_numbers<[1], [0], [0], [1], [0, 0, 1, 1], [], []>} : vector<8x4xf32>, vector<4x224xf32>, vector<8x224xf32> -> vector<8x224xf32>
    %43 = arith.addf %38, %42 : vector<8x224xf32>
    %c8 = arith.constant 8 : index
    %c0_27 = arith.constant 0 : index
    %c0_28 = arith.constant 0 : index
    %44 = vector.load %arg1[%c8, %c0_27, %c0_28] : memref<9x8x4xf32, #tpu.memory_space<vmem>>, vector<1x8x4xf32>
    %45 = vector.shape_cast %44 : vector<1x8x4xf32> to vector<8x4xf32>
    %46 = vector.extract_strided_slice %2 {offsets = [0, 34], sizes = [4, 224], strides = [1, 1]} : vector<4x258xf32> to vector<4x224xf32>
    %cst_29 = arith.constant dense<0.000000e+00> : vector<8x224xf32>
    %47 = tpu.matmul %45, %46, %cst_29 {dimension_numbers = #tpu.dot_dimension_numbers<[1], [0], [0], [1], [0, 0, 1, 1], [], []>} : vector<8x4xf32>, vector<4x224xf32>, vector<8x224xf32> -> vector<8x224xf32>
    %48 = arith.addf %43, %47 : vector<8x224xf32>
    %49 = arith.truncf %48 : vector<8x224xf32> to vector<8x224xbf16>
    %c0_30 = arith.constant 0 : index
    %c0_31 = arith.constant 0 : index
    %c0_32 = arith.constant 0 : index
    %50 = vector.load %arg3[%c0_30, %c0_31, %c0_32] : memref<1x8x224xbf16, #tpu.memory_space<vmem>>, vector<1x8x224xbf16>
    %51 = vector.shape_cast %50 : vector<1x8x224xbf16> to vector<8x224xbf16>
    %52 = vector.shape_cast %49 : vector<8x224xbf16> to vector<1x8x224xbf16>
    tpu.vector_store %arg3[%c0_30, %c0_31, %c0_32], %52 {strides = array<i32>} : memref<1x8x224xbf16, #tpu.memory_space<vmem>>, vector<1x8x224xbf16>,
    %53 = tpu.iota {dimensions = array<i32: 1>} : vector<1x224xi32>
    %c16_i32 = arith.constant 16 : i32
    %c0_i32 = arith.constant 0 : i32
    %54 = arith.cmpi eq, %c16_i32, %c0_i32 : i32
    %c1_i32 = arith.constant 1 : i32
    %55 = arith.select %54, %c1_i32, %c16_i32 : i32
    %56 = vector.broadcast %55 : i32 to vector<1x224xi32>
    %57 = arith.remsi %53, %56 : vector<1x224xi32>
    %c0_i32_33 = arith.constant 0 : i32
    %58 = vector.broadcast %c0_i32_33 : i32 to vector<1x224xi32>
    %59 = arith.cmpi ne, %57, %58 : vector<1x224xi32>
    %c0_i32_34 = arith.constant 0 : i32
    %60 = vector.broadcast %c0_i32_34 : i32 to vector<1x224xi32>
    %61 = arith.cmpi slt, %57, %60 : vector<1x224xi32>
    %c0_i32_35 = arith.constant 0 : i32
    %62 = arith.cmpi slt, %55, %c0_i32_35 : i32
    %63 = vector.broadcast %62 : i1 to vector<1x224xi1>
    %64 = vector.broadcast %63 : vector<1x224xi1> to vector<1x224xi1>
    %65 = arith.xori %61, %64 : vector<1x224xi1>
    %66 = arith.andi %65, %59 : vector<1x224xi1>
    %67 = vector.broadcast %55 : i32 to vector<1x224xi32>
    %68 = arith.addi %57, %67 : vector<1x224xi32>
    %69 = arith.select %66, %68, %57 : vector<1x224xi1>, vector<1x224xi32>
    %c14_i32 = arith.constant 14 : i32
    %70 = vector.broadcast %c14_i32 : i32 to vector<1x224xi32>
    %71 = arith.cmpi slt, %69, %70 : vector<1x224xi32>
    %cst_36 = arith.constant 0.000000e+00 : f32
    %72 = vector.shape_cast %71 : vector<1x224xi1> to vector<1x224xi1>
    %73 = vector.broadcast %72 : vector<1x224xi1> to vector<8x224xi1>
    %74 = vector.broadcast %cst_36 : f32 to vector<8x224xf32>
    %75 = arith.select %73, %48, %74 : vector<8x224xi1>, vector<8x224xf32>
    %cst_37 = arith.constant dense<0.000000e+00> : vector<8xf32>
    %76 = vector.multi_reduction <add>, %75, %cst_37 [1] : vector<8x224xf32> to vector<8xf32>
    %77 = vector.shape_cast %76 : vector<8xf32> to vector<8x1xf32>
    %c0_38 = arith.constant 0 : index
    %c0_39 = arith.constant 0 : index
    %c0_40 = arith.constant 0 : index
    %78 = vector.load %arg4[%c0_38, %c0_39, %c0_40] : memref<1x8x1xf32, #tpu.memory_space<vmem>>, vector<1x8x1xf32>
    %79 = vector.shape_cast %78 : vector<1x8x1xf32> to vector<8x1xf32>
    %80 = vector.shape_cast %77 : vector<8x1xf32> to vector<1x8x1xf32>
    tpu.vector_store %arg4[%c0_38, %c0_39, %c0_40], %80 {strides = array<i32>} : memref<1x8x1xf32, #tpu.memory_space<vmem>>, vector<1x8x1xf32>,
    %81 = arith.mulf %75, %75 : vector<8x224xf32>
    %cst_41 = arith.constant dense<0.000000e+00> : vector<8xf32>
    %82 = vector.multi_reduction <add>, %81, %cst_41 [1] : vector<8x224xf32> to vector<8xf32>
    %83 = vector.shape_cast %82 : vector<8xf32> to vector<8x1xf32>
    %c0_42 = arith.constant 0 : index
    %c0_43 = arith.constant 0 : index
    %c0_44 = arith.constant 0 : index
    %84 = vector.load %arg5[%c0_42, %c0_43, %c0_44] : memref<1x8x1xf32, #tpu.memory_space<vmem>>, vector<1x8x1xf32>
    %85 = vector.shape_cast %84 : vector<1x8x1xf32> to vector<8x1xf32>
    %86 = vector.shape_cast %83 : vector<8x1xf32> to vector<1x8x1xf32>
    tpu.vector_store %arg5[%c0_42, %c0_43, %c0_44], %86 {strides = array<i32>} : memref<1x8x1xf32, #tpu.memory_space<vmem>>, vector<1x8x1xf32>,
    return
  }
  func.func @transform_0(%arg0: i32) -> (i32, i32, i32) {
    %c0_i32 = arith.constant 0 : i32
    %c0_i32_0 = arith.constant 0 : i32
    %c0_i32_1 = arith.constant 0 : i32
    %c0_i32_2 = arith.constant 0 : i32
    return %c0_i32, %c0_i32_0, %c0_i32_1 : i32, i32, i32
  }
  func.func @transform_1(%arg0: i32) -> (i32, i32, i32) {
    %c0_i32 = arith.constant 0 : i32
    %c0_i32_0 = arith.constant 0 : i32
    %c0_i32_1 = arith.constant 0 : i32
    return %arg0, %c0_i32, %c0_i32_0 : i32, i32, i32
  }
  func.func @transform_2(%arg0: i32) -> (i32, i32, i32) {
    %c0_i32 = arith.constant 0 : i32
    %c0_i32_0 = arith.constant 0 : i32
    %c0_i32_1 = arith.constant 0 : i32
    return %arg0, %c0_i32, %c0_i32_0 : i32, i32, i32
  }
  func.func @transform_3(%arg0: i32) -> (i32, i32, i32) {
    %c0_i32 = arith.constant 0 : i32
    %c0_i32_0 = arith.constant 0 : i32
    %c0_i32_1 = arith.constant 0 : i32
    return %arg0, %c0_i32, %c0_i32_0 : i32, i32, i32
  }
  func.func @transform_4(%arg0: i32) -> (i32, i32, i32) {
    %c0_i32 = arith.constant 0 : i32
    %c0_i32_0 = arith.constant 0 : i32
    %c0_i32_1 = arith.constant 0 : i32
    return %arg0, %c0_i32, %c0_i32_0 : i32, i32, i32
  }
}

</mosaic_0001>

<bundles_post_ra>
// kernel: conv_module_forward.3
= control target key start
LH: loop header
LB: loop body
LE: loop exit
PB: predicated region body
PF: predicated region fallthrough
CT: control target
= control target key end

     0   :  { %s633_s12 = smov 0   ;;  %s822_s0 = inlined_call_operand.vmem [shape: f32[8,1,1], index: 0, kind: input, shape index: {}]   ;;  %s823_s1 = inlined_call_operand.vmem [shape: f32[8,1,1], index: 1, kind: input, shape index: {}]   ;;  %s824_s2 = inlined_call_operand.vmem [shape: bf16[2,8,14,16], index: 2, kind: input, shape index: {}]   ;;  %s825_s3 = inlined_call_operand.vmem [shape: f32[2,8,14,14], index: 3, kind: output, shape index: {}]  }
   0x1 LB: > { %s532_s13 = sadd.s32 4294967295, %s610_s12   ;;  %p536_p0 = scmp.ge.s32.totalorder %s610_s12, 1  ;;  %s610_s12 = sphi %s633_s12, %s13_s12  }
   0x2   : > { %p137_p1 = scmp.lt.s32.totalorder %s610_s12, 3 }
   0x4   : > { %p138_p2 = pnand %p536_p0, %p137_p1 }
   0x5   : > { %p161_p3 = scmp.lt.s32.totalorder (!%p138_p2), %s532_s13, 1 }
   0x6   : > { %141 = sbr.rel (%p138_p2) target bundleno = 191 (0xbf), region = 32 }
   0xb   : > { %v543_v0 = vld [vmem:[%s822_s0 + $0x2] ss:$0 sm:$0xff]  ;;  %v541_v1 = vld [vmem:[%s822_s0] ss:$0 sm:$0xff]  ;;  %v612_v2 = vmov 0   ;;  %s827_s13 = smov (!%p161_p3, %s532_s13), 1 }
   0xc   : > { %571 = vset.pattern.permute.xlu1 %v612_v2  ;;  %570 = vset.pattern.permute.xlu0 %v612_v2  ;;  %v544_v3 = vld [vmem:[%s822_s0 + $0x3] ss:$0 sm:$0xff]  ;;  %v542_v4 = vld [vmem:[%s822_s0 + $0x1] ss:$0 sm:$0xff]  ;;  %v546_v5 = vld [vmem:[%s822_s0 + $0x5] ss:$0 sm:$0xff] }
   0xd   : > { %260 = vperm.xlu1 %571, %v543_v0   ;;  %252 = vperm.xlu0 %570, %v541_v1   ;;  %v545_v6 = vld [vmem:[%s822_s0 + $0x4] ss:$0 sm:$0xff]  ;;  %v548_v7 = vld [vmem:[%s822_s0 + $0x7] ss:$0 sm:$0xff]  ;;  %v547_v8 = vld [vmem:[%s822_s0 + $0x6] ss:$0 sm:$0xff] }
   0xe   : > { %v550_v9 = vld [vmem:[%s823_s1 + $0x1] ss:$0 sm:$0xff]  ;;  %v549_v10 = vld [vmem:[%s823_s1] ss:$0 sm:$0xff]  ;;  %v552_v11 = vld [vmem:[%s823_s1 + $0x3] ss:$0 sm:$0xff] }
   0xf   : > { %v551_v12 = vld [vmem:[%s823_s1 + $0x2] ss:$0 sm:$0xff]  ;;  %v554_v13 = vld [vmem:[%s823_s1 + $0x5] ss:$0 sm:$0xff]  ;;  %v553_v14 = vld [vmem:[%s823_s1 + $0x4] ss:$0 sm:$0xff] }
  0x10   : > { %v556_v15 = vld [vmem:[%s823_s1 + $0x7] ss:$0 sm:$0xff]  ;;  %v555_v16 = vld [vmem:[%s823_s1 + $0x6] ss:$0 sm:$0xff]  ;;  %s559_s21 = sshll.u32 %s827_s13, 6  ;;  %s560_s25 = sshll.u32 %s827_s13, 7 }
  0x11   : > { %264 = vperm.xlu1 %571, %v544_v3   ;;  %256 = vperm.xlu0 %570, %v542_v4   ;;  %s699_s24 = scalar_lea.vmem %s824_s2, %s559_s21  ;;  %s768_s28 = scalar_lea.vmem %s825_s3, %s560_s25  ;;  %vm459_vm0 = vcmask 113664   ;;  %vm461_vm1 = vcmask 111616  }
  0x12   : > { %v175_v21 = vld [vmem:[%s699_s24] ss:$16 sps:$4 sm:$0xff]   ;;  %v172_v22 = vld [vmem:[%s699_s24 + $0x4] sm:$0x7]  ;;  %v177_v23 = vld [vmem:[%s699_s24 + $0x8] ss:$16 sps:$4 sm:$0xff]  }
  0x13   : > { %v174_v24 = vld [vmem:[%s699_s24 + $0xc] sm:$0x7]  ;;  %v176_v27 = vld [vmem:[%s699_s24 + $0x14] sm:$0x7]  ;;  %v187_v28 = vunpack.c.l.bf16 %v175_v21  ;;  %v188_v29 = vunpack.c.l.bf16 %v172_v22  ;;  %v178_v30 = vld [vmem:[%s699_s24 + $0x1c] sm:$0x7]  ;;  %v189_v31 = vunpack.c.l.bf16 %v177_v23  ;;  %v191_v36 = vunpack.c.h.bf16 %v175_v21 }
  0x14   : > { %v190_v32 = vunpack.c.l.bf16 %v174_v24  ;;  %v181_v33 = vld [vmem:[%s699_s24 + $0x20] ss:$8 sps:$4 sm:$0xff]   ;;  %v182_v37 = vld [vmem:[%s699_s24 + $0x2c] sm:$0x7]  ;;  %v180_v38 = vld [vmem:[%s699_s24 + $0x24] sm:$0x7]  ;;  %v192_v40 = vunpack.c.l.bf16 %v176_v27  ;;  %v193_v41 = vunpack.c.h.bf16 %v177_v23  ;;  %v194_v42 = vunpack.c.l.bf16 %v178_v30 }
  0x15   : > { %272 = vperm.xlu1 %571, %v546_v5   ;;  %268 = vperm.xlu0 %570, %v545_v6   ;;  %v185_v39 = vld [vmem:[%s699_s24 + $0x30] ss:$8 sps:$4 sm:$0xff]   ;;  %v197_v43 = vunpack.c.h.bf16 %v181_v33  ;;  %v186_v48 = vld [vmem:[%s699_s24 + $0x3c] sm:$0x7]  ;;  %v198_v49 = vunpack.c.l.bf16 %v182_v37  ;;  %v195_v50 = vunpack.c.l.bf16 %v181_v33  ;;  %v196_v51 = vunpack.c.l.bf16 %v180_v38  ;;  %v184_v55 = vld [vmem:[%s699_s24 + $0x34] sm:$0x7] }
  0x16   : > { %v201_v52 = vunpack.c.h.bf16 %v185_v39  ;;  %v202_v62 = vunpack.c.l.bf16 %v186_v48  ;;  %v199_v63 = vunpack.c.l.bf16 %v185_v39  ;;  %v200_v6 = vunpack.c.l.bf16 %v184_v55 }
  0x19   : > { %280 = vperm.xlu1 %571, %v548_v7   ;;  %276 = vperm.xlu0 %570, %v547_v8  }
  0x1d   : > { %352 = vperm.xlu1 %571, %v550_v9   ;;  %348 = vperm.xlu0 %570, %v549_v10  }
  0x21   : > { %360 = vperm.xlu1 %571, %v552_v11   ;;  %356 = vperm.xlu0 %570, %v551_v12  }
  0x25   : > { %368 = vperm.xlu1 %571, %v554_v13   ;;  %364 = vperm.xlu0 %570, %v553_v14  }
  0x29   : > { %376 = vperm.xlu1 %571, %v556_v15   ;;  %372 = vperm.xlu0 %570, %v555_v16  }
  0x88   : > { %v261_v17 = vpop.permute.xlu1 %260  ;;  %v253_v18 = vpop.permute.xlu0 %252 }
  0x89   : > { %v283_v44 = vmul.f32 %v253_v18, %v187_v28  ;;  %v284_v45 = vmul.f32 %v253_v18, %v188_v29  ;;  %v287_v60 = vmul.f32 %v261_v17, %v191_v36  ;;  %v288_v4 = vmul.f32 %v261_v17, %v192_v40 }
  0x8c   : > { %v265_v19 = vpop.permute.xlu1 %264  ;;  %v257_v20 = vpop.permute.xlu0 %256 }
  0x8d   : > { %v285_v46 = vmul.f32 %v257_v20, %v189_v31  ;;  %v286_v47 = vmul.f32 %v257_v20, %v190_v32  ;;  %v289_v61 = vmul.f32 %v265_v19, %v193_v41  ;;  %v290_v0 = vmul.f32 %v265_v19, %v194_v42 }
  0x90   : > { %v273_v25 = vpop.permute.xlu1 %272  ;;  %v269_v26 = vpop.permute.xlu0 %268 }
  0x91   : > { %v293_v5 = vmul.f32 %v273_v25, %v197_v43  ;;  %v294_v13 = vmul.f32 %v273_v25, %v198_v49  ;;  %v291_v14 = vmul.f32 %v269_v26, %v195_v50  ;;  %v292_v19 = vmul.f32 %v269_v26, %v196_v51 }
  0x94   : > { %v281_v34 = vpop.permute.xlu1 %280  ;;  %v708_v35 = vpop.permute.xlu0 %276 }
  0x95   : > { %v297_v20 = vmul.f32 %v281_v34, %v201_v52  ;;  %v298_v28 = vmul.f32 %v281_v34, %v202_v62  ;;  %v295_v29 = vmul.f32 %v708_v35, %v199_v63  ;;  %v296_v33 = vmul.f32 %v708_v35, %v200_v6 }
  0x98   : > { %v353_v53 = vpop.permute.xlu1 %352  ;;  %v349_v54 = vpop.permute.xlu0 %348 }
  0x99   : > { %v381_v56 = vadd.f32 %v353_v53, %v285_v46  ;;  %v382_v57 = vadd.f32 %v353_v53, %v286_v47  ;;  %v379_v58 = vadd.f32 %v349_v54, %v283_v44  ;;  %v380_v59 = vadd.f32 %v349_v54, %v284_v45 }
  0x9b   : > { %v715_v1 = vmul.f32 0.5, %v381_v56  ;;  %v717_v2 = vmul.f32 0.5, %v382_v57  ;;  %v719_v3 = vmul.f32 0.5, %v379_v58  ;;  %v721_v7 = vmul.f32 0.5, %v380_v59 }
  0x9c   : > { %v361_v8 = vpop.permute.xlu1 %360  ;;  %v357_v9 = vpop.permute.xlu0 %356 }
  0x9d   : > { %572 = vtanh.f32 %v715_v1  ;;  %v385_v10 = vadd.f32 %v361_v8, %v289_v61  ;;  %v386_v11 = vadd.f32 %v361_v8, %v290_v0  ;;  %v383_v12 = vadd.f32 %v357_v9, %v287_v60 }
  0x9e   : > { %574 = vtanh.f32 %v717_v2  ;;  %v384_v15 = vadd.f32 %v357_v9, %v288_v4 }
  0x9f   : > { %576 = vtanh.f32 %v719_v3  ;;  %v726_v16 = vmul.f32 0.5, %v385_v10  ;;  %v728_v17 = vmul.f32 0.5, %v386_v11  ;;  %v730_v18 = vmul.f32 0.5, %v383_v12 }
  0xa0   : > { %578 = vtanh.f32 %v721_v7  ;;  %v733_v21 = vmul.f32 0.5, %v384_v15  ;;  %v369_v22 = vpop.permute.xlu1 %368  ;;  %v365_v23 = vpop.permute.xlu0 %364 }
  0xa1   : > { %580 = vtanh.f32 %v726_v16  ;;  %v389_v24 = vadd.f32 %v369_v22, %v293_v5  ;;  %v390_v25 = vadd.f32 %v369_v22, %v294_v13  ;;  %v387_v27 = vadd.f32 %v365_v23, %v291_v14 }
  0xa2   : > { %582 = vtanh.f32 %v728_v17  ;;  %v388_v30 = vadd.f32 %v365_v23, %v292_v19 }
  0xa3   : > { %584 = vtanh.f32 %v730_v18  ;;  %v739_v26 = vmul.f32 0.5, %v389_v24  ;;  %v741_v31 = vmul.f32 0.5, %v390_v25  ;;  %v743_v32 = vmul.f32 0.5, %v387_v27 }
  0xa4   : > { %586 = vtanh.f32 %v733_v21  ;;  %v747_v36 = vmul.f32 0.5, %v388_v30  ;;  %v377_v34 = vpop.permute.xlu1 %376  ;;  %v373_v37 = vpop.permute.xlu0 %372 }
  0xa5   : > { %588 = vtanh.f32 %v739_v26  ;;  %v393_v38 = vadd.f32 %v377_v34, %v297_v20  ;;  %v394_v39 = vadd.f32 %v377_v34, %v298_v28  ;;  %v391_v40 = vadd.f32 %v373_v37, %v295_v29 }
  0xa6   : > { %590 = vtanh.f32 %v741_v31  ;;  %v392_v41 = vadd.f32 %v373_v37, %v296_v33 }
  0xa7   : > { %592 = vtanh.f32 %v743_v32  ;;  %v752_v42 = vmul.f32 0.5, %v393_v38  ;;  %v754_v35 = vmul.f32 0.5, %v394_v39  ;;  %v756_v43 = vmul.f32 0.5, %v391_v40 }
  0xa8   : > { %594 = vtanh.f32 %v747_v36  ;;  %v759_v44 = vmul.f32 0.5, %v392_v41 }
  0xa9   : > { %596 = vtanh.f32 %v752_v42 }
  0xaa   : > { %v573_v45 = vpop.eup %572  ;;  %598 = vtanh.f32 %v754_v35 }
  0xab   : > { %v575_v46 = vpop.eup %574  ;;  %v429_v47 = vadd.f32 1.0, %v573_v45  ;;  %600 = vtanh.f32 %v756_v43 }
  0xac   : > { %v577_v48 = vpop.eup %576  ;;  %v430_v49 = vadd.f32 1.0, %v575_v46  ;;  %602 = vtanh.f32 %v759_v44 }
  0xad   : > { %v579_v50 = vpop.eup %578  ;;  %v445_v51 = vmul.f32 %v429_v47, %v715_v1  ;;  %v427_v52 = vadd.f32 1.0, %v577_v48 }
  0xae   : > { %v581_v53 = vpop.eup %580  ;;  %v446_v54 = vmul.f32 %v430_v49, %v717_v2  ;;  %v428_v55 = vadd.f32 1.0, %v579_v50 }
  0xaf   : > { %v583_v56 = vpop.eup %582  ;;  %463 = vst.msk [vmem:[%s768_s28 + $0x10] sm:$0xff] %vm459_vm0, %v445_v51  ;;  %v443_v57 = vmul.f32 %v427_v52, %v719_v3  ;;  %v433_v58 = vadd.f32 1.0, %v581_v53 }
  0xb0   : > { %v585_v59 = vpop.eup %584  ;;  %464 = vst.msk [vmem:[%s768_s28 + $0x18] sm:$0x3f] %vm461_vm1, %v446_v54  ;;  %v444_v60 = vmul.f32 %v428_v55, %v721_v7  ;;  %v434_v61 = vadd.f32 1.0, %v583_v56 }
  0xb1   : > { %v587_v62 = vpop.eup %586  ;;  %460 = vst.msk [vmem:[%s768_s28] sm:$0xff] %vm459_vm0, %v443_v57  ;;  %v449_v63 = vmul.f32 %v433_v58, %v726_v16  ;;  %v431_v0 = vadd.f32 1.0, %v585_v59 }
  0xb2   : > { %v589_v1 = vpop.eup %588  ;;  %462 = vst.msk [vmem:[%s768_s28 + $0x8] sm:$0x3f] %vm461_vm1, %v444_v60  ;;  %v450_v2 = vmul.f32 %v434_v61, %v728_v17  ;;  %v432_v3 = vadd.f32 1.0, %v587_v62 }
  0xb3   : > { %v591_v4 = vpop.eup %590  ;;  %467 = vst.msk [vmem:[%s768_s28 + $0x30] sm:$0xff] %vm459_vm0, %v449_v63  ;;  %v447_v5 = vmul.f32 %v431_v0, %v730_v18  ;;  %v437_v6 = vadd.f32 1.0, %v589_v1 }
  0xb4   : > { %v593_v7 = vpop.eup %592  ;;  %468 = vst.msk [vmem:[%s768_s28 + $0x38] sm:$0x3f] %vm461_vm1, %v450_v2  ;;  %v448_v8 = vmul.f32 %v432_v3, %v733_v21  ;;  %v438_v9 = vadd.f32 1.0, %v591_v4 }
  0xb5   : > { %v595_v10 = vpop.eup %594  ;;  %465 = vst.msk [vmem:[%s768_s28 + $0x20] sm:$0xff] %vm459_vm0, %v447_v5  ;;  %v453_v11 = vmul.f32 %v437_v6, %v739_v26  ;;  %v435_v12 = vadd.f32 1.0, %v593_v7 }
  0xb6   : > { %v597_v13 = vpop.eup %596  ;;  %466 = vst.msk [vmem:[%s768_s28 + $0x28] sm:$0x3f] %vm461_vm1, %v448_v8  ;;  %v454_v14 = vmul.f32 %v438_v9, %v741_v31  ;;  %v436_v15 = vadd.f32 1.0, %v595_v10 }
  0xb7   : > { %v599_v16 = vpop.eup %598  ;;  %471 = vst.msk [vmem:[%s768_s28 + $0x50] sm:$0xff] %vm459_vm0, %v453_v11  ;;  %v451_v17 = vmul.f32 %v435_v12, %v743_v32  ;;  %v441_v18 = vadd.f32 1.0, %v597_v13 }
  0xb8   : > { %v601_v19 = vpop.eup %600  ;;  %472 = vst.msk [vmem:[%s768_s28 + $0x58] sm:$0x3f] %vm461_vm1, %v454_v14  ;;  %v452_v20 = vmul.f32 %v436_v15, %v747_v36  ;;  %v442_v21 = vadd.f32 1.0, %v599_v16 }
  0xb9   : > { %v603_v22 = vpop.eup %602  ;;  %469 = vst.msk [vmem:[%s768_s28 + $0x40] sm:$0xff] %vm459_vm0, %v451_v17  ;;  %v457_v23 = vmul.f32 %v441_v18, %v752_v42  ;;  %v439_v24 = vadd.f32 1.0, %v601_v19 }
  0xba   : > { %470 = vst.msk [vmem:[%s768_s28 + $0x48] sm:$0x3f] %vm461_vm1, %v452_v20  ;;  %v458_v25 = vmul.f32 %v442_v21, %v754_v35  ;;  %v440_v27 = vadd.f32 1.0, %v603_v22 }
  0xbb   : > { %475 = vst.msk [vmem:[%s768_s28 + $0x70] sm:$0xff] %vm459_vm0, %v457_v23  ;;  %v455_v28 = vmul.f32 %v439_v24, %v756_v43 }
  0xbc   : > { %476 = vst.msk [vmem:[%s768_s28 + $0x78] sm:$0x3f] %vm461_vm1, %v458_v25  ;;  %v456_v29 = vmul.f32 %v440_v27, %v759_v44 }
  0xbd   : > { %473 = vst.msk [vmem:[%s768_s28 + $0x60] sm:$0xff] %vm459_vm0, %v455_v28 }
  0xbe   : > { %474 = vst.msk [vmem:[%s768_s28 + $0x68] sm:$0x3f] %vm461_vm1, %v456_v29 }
  0xbf PF: > { %s13_s12 = sadd.s32 1, %s610_s12  }
  0xc0   : > { %p10_p4 = scmp.ge.s32.totalorder %s13_s12, 4  }
  0xc2   :  { %12 = sbr.rel (!%p10_p4) target bundleno = 1 (0x1), region = 62 }

// kernel: conv_module_forward.2
= control target key start
LH: loop header
LB: loop body
LE: loop exit
PB: predicated region body
PF: predicated region fallthrough
CT: control target
= control target key end

     0   :  { %s1340_s15 = smov 0   ;;  %s1437_s0 = inlined_call_operand.vmem [shape: f32[9,8,4], index: 0, kind: input, shape index: {}]   ;;  %s1438_s1 = inlined_call_operand.vmem [shape: bf16[2,4,258], index: 1, kind: input, shape index: {}]   ;;  %s1439_s2 = inlined_call_operand.vmem [shape: bf16[2,8,224], index: 2, kind: output, shape index: {0}]   ;;  %s1440_s3 = inlined_call_operand.vmem [shape: f32[2,8,1], index: 3, kind: output, shape index: {1}]   ;;  %s1441_s4 = inlined_call_operand.vmem [shape: f32[2,8,1], index: 4, kind: output, shape index: {2}]  }
   0x1 LB: > { %s1190_s16 = sadd.s32 4294967295, %s1304_s15   ;;  %p1194_p0 = scmp.ge.s32.totalorder %s1304_s15, 1  ;;  %s1304_s15 = sphi %s1340_s15, %s15_s15  }
   0x2   : > { %p167_p1 = scmp.lt.s32.totalorder %s1304_s15, 3 }
   0x4   : > { %p168_p2 = pnand %p1194_p0, %p167_p1 }
   0x5   : > { %p201_p3 = scmp.lt.s32.totalorder (!%p168_p2), %s1190_s16, 1  ;;  %s1307_s21 = smov (!%p168_p2), 95  }
   0x6   : > { %171 = sbr.rel (%p168_p2) target bundleno = 500 (0x1f4), region = 28  ;;  %s1308_s24 = smov (!%p168_p2), 127  }
   0x7   : > { %s1309_s25 = smov (!%p168_p2), 112   ;;  %s1310_s26 = smov (!%p168_p2), 126  }
   0x8   : > { %s1311_s27 = smov (!%p168_p2), 111   ;;  %s1312_s28 = smov (!%p168_p2), 110  }
   0x9   : > { %s1313_s29 = smov (!%p168_p2), 96   ;;  %s1314_s30 = smov (!%p168_p2), 94  }
   0xb   : > { %s1443_s16 = smov (!%p201_p3, %s1190_s16), 1  ;;  %v1306_v0 = vmov 0.0   ;;  %vm237_vm0 = vcmask 1043456   ;;  %vm233_vm1 = vcmask 31744   ;;  %v222_v5 = vld [vmem:[%s1437_s0] sm:$0xff]  ;;  %vm231_vm2 = vcmask 1039360  }
   0xc   : > { %s1240_s17 = smul.u32 6, %s1443_s16  ;;  %306 = vmatprep.mubr.f32.mxu0 %v1306_v0  ;;  %384 = vmatprep.mubr.f32.mxu1 %v1306_v0  ;;  %vm485_vm3 = vcmask 916480   ;;  %v1200_v15 = vld [vmem:[%s1437_s0 + $0x8] sm:$0xff]  ;;  %v1211_v16 = vld [vmem:[%s1437_s0 + $0x18] sm:$0xff]  ;;  %vm397_vm4 = vcmask 1031168   ;;  %vm573_vm5 = vcmask 908288   ;;  %v1025_v58 = vlaneseq }
   0xd   : > { %v1207_v25 = vld [vmem:[%s1437_s0 + $0x10] sm:$0xff]  ;;  %vm661_vm6 = vcmask 900096   ;;  %vm749_vm7 = vcmask 785408   ;;  %v1215_v34 = vld [vmem:[%s1437_s0 + $0x20] sm:$0xff]  ;;  %v1219_v35 = vld [vmem:[%s1437_s0 + $0x28] sm:$0xff]  ;;  %vm840_vm8 = vcmask 777216  }
   0xe   : > { %s205_s20 = scalar_lea.vmem %s1438_s1, %s1240_s17  ;;  %v1223_v41 = vld [vmem:[%s1437_s0 + $0x30] sm:$0xff]  ;;  %v1227_v44 = vld [vmem:[%s1437_s0 + $0x38] sm:$0xff]  ;;  %vm931_vm9 = vcmask 769024   ;;  %v1231_v51 = vld [vmem:[%s1437_s0 + $0x40] sm:$0xff]  ;;  %s1238_s23 = sshll.u32 %s1443_s16, 3  ;;  %vm1022_vm11 = vcmask 785412  }
   0xf   : > { %v219_v1 = vld [vmem:[%s205_s20] sm:$0x3f]  ;;  %vm1023_vm13 = vmor %vm1022_vm11, %vm237_vm0  ;;  %vm1064_vm14 = vcmask 7168   ;;  %s218_s5 = scalar_lea.vmem %s1441_s4, %s1238_s23 }
  0x10   : > { %v220_v2 = vunpack.c.l.bf16 %v219_v1  ;;  %v221_v6 = vunpack.c.h.bf16 %v219_v1 }
  0x12   : > { %834 = vrot.lane.b32.xlu1 %v220_v2, %s1307_s21  ;;  %v226_v3 = vcombine.high %v220_v2, %v220_v2 }
  0x14   : > { %v1258_v4 = vpack.i.bf16 %v226_v3, %v220_v2  ;;  %1204 = vmatprep.subr.msk.mxu1 %vm237_vm0, %v226_v3  ;;  %v1288_v7 = vpack.i.bf16 %v221_v6, %v226_v3 }
  0x15   : > { %1205 = vmatpush1.msk.msra.mxu1 %vm237_vm0, %v220_v2 }
  0x16   : > { %1259 = vrot.lane.b32.xlu0 %v1258_v4, %s1308_s24  ;;  %1269 = vrot.lane.b32.xlu1 %v1258_v4, %s1309_s25 }
  0x17   : > { %1206 = vmatmul.mubr.msk.f32.vlgmr.msra.gmra.mxu1 %vm233_vm1, %v222_v5 }
  0x18   : > { %558 = vmatprep.mubr.f32.mxu1 %v1306_v0 }
  0x1a   : > { %1264 = vrot.lane.b32.xlu0 %v1258_v4, %s1310_s26  ;;  %1274 = vrot.lane.b32.xlu1 %v1258_v4, %s1311_s27  ;;  %s210_s26 = scalar_lea.vmem %s1439_s2, %s1238_s23 }
  0x1e   : > { %1279 = vrot.lane.b32.xlu0 %v1258_v4, %s1312_s28  ;;  %1284 = vrot.lane.b32.xlu1 %v1258_v4, %s1313_s29  ;;  %s214_s28 = scalar_lea.vmem %s1440_s3, %s1238_s23 }
  0x22   : > { %1289 = vrot.lane.b32.xlu0 %v1288_v7, %s1307_s21  ;;  %925 = vrot.lane.b32.xlu1 %v220_v2, %s1314_s30  ;;  %v1026_v2 = vand.u32 127, %v1025_v58 }
  0x26   : > { %1294 = vrot.lane.b32.xlu0 %v1288_v7, %s1314_s30 }
  0x84   : > { %v1363_v8 = vpop.permute.xlu1 %834 }
  0x88   : > { %v1260_v9 = vpop.permute.xlu0 %1259  ;;  %v1270_v10 = vpop.permute.xlu1 %1269 }
  0x89   : > { %v1261_v11 = vunpack.i.l.bf16 %v1260_v9  ;;  %v1262_v12 = vunpack.i.h.bf16 %v1260_v9  ;;  %v1272_v13 = vunpack.i.h.bf16 %v1270_v10  ;;  %v1271_v14 = vunpack.i.l.bf16 %v1270_v10 }
  0x8b   : > { %1201 = vmatprep.subr.msk.mxu0 %vm237_vm0, %v1262_v12  ;;  %v232_v17 = vsel %vm231_vm2, %v1261_v11, %v1262_v12  ;;  %1212 = vmatprep.subr.msk.mxu1 %vm237_vm0, %v1272_v13  ;;  %v486_v18 = vsel %vm485_vm3, %v1271_v14, %v1272_v13  ;;  %v1027_v11 = vadd.s32 128, %v1026_v2 }
  0x8c   : > { %v1265_v19 = vpop.permute.xlu0 %1264  ;;  %1202 = vmatpush1.msk.msra.mxu0 %vm237_vm0, %v232_v17  ;;  %v1275_v20 = vpop.permute.xlu1 %1274  ;;  %1213 = vmatpush1.msk.msra.mxu1 %vm237_vm0, %v486_v18  ;;  %v1032_v17 = vand.u32 15, %v1026_v2 }
  0x8d   : > { %v1267_v21 = vunpack.i.h.bf16 %v1265_v19  ;;  %v1266_v22 = vunpack.i.l.bf16 %v1265_v19  ;;  %1203 = vmatmul.mubr.msk.f32.vlgmr.msra.gmra.mxu0 %vm233_vm1, %v1200_v15  ;;  %v1277_v23 = vunpack.i.h.bf16 %v1275_v20  ;;  %v1276_v24 = vunpack.i.l.bf16 %v1275_v20  ;;  %1214 = vmatmul.mubr.msk.f32.vlgmr.msra.gmra.mxu1 %vm233_vm1, %v1211_v16 }
  0x8e   : > { %470 = vmatprep.mubr.f32.mxu0 %v1306_v0  ;;  %734 = vmatprep.mubr.f32.mxu1 %v1306_v0  ;;  %vm1052_vm10 = vcmp.lt.s32.totalorder %v1032_v17, 14 }
  0x8f   : > { %1208 = vmatprep.subr.msk.mxu0 %vm237_vm0, %v1267_v21  ;;  %v398_v26 = vsel %vm397_vm4, %v1266_v22, %v1267_v21  ;;  %v574_v27 = vsel %vm573_vm5, %v1276_v24, %v1277_v23  ;;  %v1039_v21 = vand.u32 15, %v1027_v11 }
  0x90   : > { %v1280_v28 = vpop.permute.xlu0 %1279  ;;  %1209 = vmatpush1.msk.msra.mxu0 %vm237_vm0, %v398_v26  ;;  %v1285_v29 = vpop.permute.xlu1 %1284 }
  0x91   : > { %v1282_v30 = vunpack.i.h.bf16 %v1280_v28  ;;  %v1281_v31 = vunpack.i.l.bf16 %v1280_v28  ;;  %1210 = vmatmul.mubr.msk.f32.vlgmr.msra.gmra.mxu0 %vm233_vm1, %v1207_v25  ;;  %1216 = vmatprep.subr.msk.mxu0 %vm237_vm0, %v1277_v23  ;;  %v1287_v32 = vunpack.i.h.bf16 %v1285_v29  ;;  %v1286_v33 = vunpack.i.l.bf16 %v1285_v29 }
  0x92   : > { %1217 = vmatpush1.msk.msra.mxu0 %vm237_vm0, %v574_v27  ;;  %646 = vmatprep.mubr.f32.mxu0 %v1306_v0  ;;  %vm1053_vm12 = vcmp.lt.s32.totalorder %v1039_v21, 14 }
  0x93   : > { %1220 = vmatprep.subr.msk.mxu1 %vm237_vm0, %v1282_v30  ;;  %v662_v36 = vsel %vm661_vm6, %v1281_v31, %v1282_v30  ;;  %1224 = vmatprep.subr.msk.mxu0 %vm237_vm0, %v1287_v32  ;;  %v750_v37 = vsel %vm749_vm7, %v1286_v33, %v1287_v32 }
  0x94   : > { %v1290_v38 = vpop.permute.xlu0 %1289  ;;  %1221 = vmatpush1.msk.msra.mxu1 %vm237_vm0, %v662_v36  ;;  %v926_v46 = vpop.permute.xlu1 %925 }
  0x95   : > { %v1292_v39 = vunpack.i.h.bf16 %v1290_v38  ;;  %v1291_v40 = vunpack.i.l.bf16 %v1290_v38  ;;  %1218 = vmatmul.mubr.msk.f32.vlgmr.msra.gmra.mxu0 %vm233_vm1, %v1215_v34  ;;  %1222 = vmatmul.mubr.msk.f32.vlgmr.msra.gmra.mxu1 %vm233_vm1, %v1219_v35 }
  0x96   : > { %1225 = vmatpush1.msk.msra.mxu0 %vm237_vm0, %v750_v37  ;;  %822 = vmatprep.mubr.f32.mxu0 %v1306_v0 }
  0x97   : > { %v842_v42 = vsel %vm840_vm8, %v1291_v40, %v1292_v39  ;;  %v841_v43 = vsel %vm840_vm8, %v1363_v8, %v1291_v40  ;;  %914 = vmatprep.mubr.f32.mxu1 %v1306_v0 }
  0x98   : > { %v1295_v45 = vpop.permute.xlu0 %1294  ;;  %1228 = vmatprep.subr.msk.mxu1 %vm237_vm0, %v842_v42 }
  0x99   : > { %v1297_v47 = vunpack.i.h.bf16 %v1295_v45  ;;  %v1296_v48 = vunpack.i.l.bf16 %v1295_v45  ;;  %1226 = vmatmul.mubr.msk.f32.vlgmr.msra.gmra.mxu0 %vm233_vm1, %v1223_v41  ;;  %1229 = vmatpush1.msk.msra.mxu1 %vm237_vm0, %v841_v43 }
  0x9a   : > { %1230 = vmatmul.mubr.msk.f32.vlgmr.msra.gmra.mxu1 %vm233_vm1, %v1227_v44  ;;  %1005 = vmatprep.mubr.f32.mxu0 %v1306_v0 }
  0x9b   : > { %v932_v49 = vsel %vm931_vm9, %v926_v46, %v1296_v48  ;;  %v933_v50 = vsel %vm931_vm9, %v1296_v48, %v1297_v47 }
  0x9c   : > { %1232 = vmatprep.subr.msk.mxu0 %vm237_vm0, %v933_v50 }
  0x9d   : > { %1233 = vmatpush1.msk.msra.mxu0 %vm237_vm0, %v932_v49 }
  0x9e   : > { %1234 = vmatmul.mubr.msk.f32.vlgmr.msra.gmra.mxu0 %vm233_vm1, %v1231_v51 }
  0xd7   : > { %v386_v52 = vpop.f32.mrf.mxu1 }
  0xd9   : > { %v388_v53 = vpop.f32.mrf.mxu1 }
 0x14d   : > { %v308_v54 = vpop.f32.mrf.mxu0  ;;  %v560_v55 = vpop.f32.mrf.mxu1 }
 0x14e   : > { %v387_v56 = vadd.f32 %v386_v52, %v308_v54 }
 0x14f   : > { %v310_v57 = vpop.f32.mrf.mxu0  ;;  %v562_v60 = vpop.f32.mrf.mxu1 }
 0x150   : > { %v389_v61 = vadd.f32 %v388_v53, %v310_v57 }
 0x151   : > { %v472_v59 = vpop.f32.mrf.mxu0 }
 0x152   : > { %v477_v62 = vadd.f32 %v472_v59, %v387_v56 }
 0x153   : > { %v474_v63 = vpop.f32.mrf.mxu0 }
 0x154   : > { %v478_v0 = vadd.f32 %v474_v63, %v389_v61  ;;  %v565_v1 = vadd.f32 %v560_v55, %v477_v62 }
 0x155   : > { %v648_v3 = vpop.f32.mrf.mxu0  ;;  %v736_v4 = vpop.f32.mrf.mxu1 }
 0x156   : > { %v566_v5 = vadd.f32 %v562_v60, %v478_v0  ;;  %v653_v6 = vadd.f32 %v648_v3, %v565_v1 }
 0x157   : > { %v650_v7 = vpop.f32.mrf.mxu0  ;;  %v738_v8 = vpop.f32.mrf.mxu1 }
 0x158   : > { %v654_v9 = vadd.f32 %v650_v7, %v566_v5  ;;  %v741_v10 = vadd.f32 %v736_v4, %v653_v6 }
 0x159   : > { %v824_v12 = vpop.f32.mrf.mxu0 }
 0x15a   : > { %v742_v13 = vadd.f32 %v738_v8, %v654_v9  ;;  %v829_v14 = vadd.f32 %v824_v12, %v741_v10  ;;  %v916_v15 = vpop.f32.mrf.mxu1 }
 0x15b   : > { %v826_v16 = vpop.f32.mrf.mxu0 }
 0x15c   : > { %v830_v18 = vadd.f32 %v826_v16, %v742_v13  ;;  %v921_v19 = vadd.f32 %v916_v15, %v829_v14  ;;  %v918_v20 = vpop.f32.mrf.mxu1 }
 0x15e   : > { %v922_v22 = vadd.f32 %v918_v20, %v830_v18  ;;  %v1007_v23 = vpop.f32.mrf.mxu0 }
 0x15f   : > { %v1012_v24 = vadd.f32 %v1007_v23, %v921_v19 }
 0x160   : > { %v1009_v25 = vpop.f32.mrf.mxu0 }
 0x161   : > { %v1013_v26 = vadd.f32 %v1009_v25, %v922_v22  ;;  %v1058_v27 = vsel %vm1052_vm10, %v1012_v24, 0.0 }
 0x162   : > { %v1066_v33 = vmul.f32 %v1058_v27, %v1058_v27 }
 0x163   : > { %v1239_v28 = vpack.c.bf16 %v1013_v26, %v1012_v24  ;;  %v1059_v29 = vsel %vm1053_vm12, %v1013_v26, 0.0 }
 0x164   : > { %v1067_v30 = vmul.f32 %v1059_v29, %v1059_v29  ;;  %v1060_v31 = vsel %vm749_vm7, %v1059_v29, 0.0 }
 0x165   : > { %v1061_v32 = vadd.f32 %v1060_v31, %v1058_v27  ;;  %1024 = vst.msk [vmem:[%s210_s26] sm:$0xff] %vm1023_vm13, %v1239_v28 }
 0x166   : > { %v1068_v34 = vsel %vm749_vm7, %v1067_v30, 0.0 }
 0x167   : > { %1062 = vadd.xlane.f32.xlu0 %v1061_v32  ;;  %v1069_v35 = vadd.f32 %v1068_v34, %v1066_v33 }
 0x169   : > { %1070 = vadd.xlane.f32.xlu1 %v1069_v35 }
 0x1f0   : > { %v1063_v36 = vpop.xlane.xlu0 %1062 }
 0x1f1   : > { %1065 = vst.msk [vmem:[%s214_s28] sm:$0xff] %vm1064_vm14, %v1063_v36 }
 0x1f2   : > { %v1071_v37 = vpop.xlane.xlu1 %1070 }
 0x1f3   : > { %1072 = vst.msk [vmem:[%s218_s5] sm:$0xff] %vm1064_vm14, %v1071_v37 }
 0x1f4 PF: > { %s15_s15 = sadd.s32 1, %s1304_s15  }
 0x1f5   : > { %p12_p4 = scmp.ge.s32.totalorder %s15_s15, 4  }
 0x1f7   :  { %14 = sbr.rel (!%p12_p4) target bundleno = 1 (0x1), region = 90 }

</bundles_post_ra>
